<compile_context>
chip_gen: v7x
topology: tpu7x:2x2x1
jax: 0.10.0
libtpu: 0.0.40
codegen_flags: <defaults>
</compile_context>

<pallas_src>
import functools

import jax
import jax.numpy as jnp
from jax.experimental import pallas as pl
from jax.experimental.pallas import tpu as pltpu


# ---------------------------------------------------------------------------
# Config (small synthetic shapes consistent with the module's __init__)
# ---------------------------------------------------------------------------
SHARED_DIM = 10
SEPERATE_DIM = 12
GOAL_DIM = 8
NUM_GOALS = 4
SINGLE_SEP_DIM = SEPERATE_DIM // NUM_GOALS       # 3
SINGLE_GOAL_DIM = GOAL_DIM // NUM_GOALS          # 2
STATE_DIM = SHARED_DIM + SEPERATE_DIM + GOAL_DIM  # 30
IN_DIM = SHARED_DIM + SINGLE_SEP_DIM + SINGLE_GOAL_DIM  # 15
NET_DIM = 32
ACTION_DIM = 4
SHARED_NET_LAYER = 2
NET_LAYER = 4

K_PAD = 32                       # state lanes padded 30 -> 32 (clean sublane K)
WIDTH = NUM_GOALS * NET_DIM      # 128 : per-goal hidden units stacked on lanes
W_ROWS = K_PAD + 3 * WIDTH       # 416 : packed weight slab rows
B_ROWS = 8                       # packed bias slab rows (4 used, padded to 8)


# ---------------------------------------------------------------------------
# One-time parameter packing (pure JAX, outside the kernel / hot path)
# ---------------------------------------------------------------------------
def pack_params(params, compute_dtype=jnp.float32):
    """Pack the 4 Linear layers into one weight slab and one bias slab.

    weight slab [416, 128]:
      rows   0: 32  layer A  (deepset layer-0, fused slice/broadcast/concat)
      rows  32:160  layer B  (deepset layer-1, block-diagonal over goals)
      rows 160:288  layer C  (mean-pool fused with post-pool hidden layer)
      rows 288:416  layer D  (final linear, lane-padded to 128)
    bias slab [8, 128]: rows 0..3 = biases of layers A..D (lane-padded).
    """
    (w0, b0), (w1, b1), (w2, b2), (w3, b3) = params
    G, ND = NUM_GOALS, NET_DIM

    w_a = jnp.zeros((K_PAD, WIDTH), jnp.float32)
    w_b = jnp.zeros((WIDTH, WIDTH), jnp.float32)
    for g in range(G):
        c = g * ND
        # grip rows are shared by every goal block (no broadcast at runtime)
        w_a = w_a.at[:SHARED_DIM, c:c + ND].set(w0[:SHARED_DIM])
        r = SHARED_DIM + g * SINGLE_SEP_DIM
        w_a = w_a.at[r:r + SINGLE_SEP_DIM, c:c + ND].set(
            w0[SHARED_DIM:SHARED_DIM + SINGLE_SEP_DIM])
        r = SHARED_DIM + SEPERATE_DIM + g * SINGLE_GOAL_DIM
        w_a = w_a.at[r:r + SINGLE_GOAL_DIM, c:c + ND].set(
            w0[SHARED_DIM + SINGLE_SEP_DIM:])
        # per-goal shared second deepset layer -> block diagonal
        w_b = w_b.at[c:c + ND, c:c + ND].set(w1)

    # mean over goals fused into the post-pool hidden layer:
    #   pooled @ w2 == h1 @ (tile(w2, (G,1)) / G)
    w_c = jnp.zeros((WIDTH, WIDTH), jnp.float32).at[:, :ND].set(
        jnp.tile(w2, (G, 1)) / G)
    # final linear, lane-padded to 128 for unmasked output stores
    w_d = jnp.zeros((WIDTH, WIDTH), jnp.float32).at[:ND, :ACTION_DIM].set(w3)

    w_packed = jnp.concatenate([w_a, w_b, w_c, w_d], axis=0).astype(compute_dtype)

    b_packed = jnp.zeros((B_ROWS, WIDTH), jnp.float32)
    b_packed = b_packed.at[0].set(jnp.tile(b0[0], G))
    b_packed = b_packed.at[1].set(jnp.tile(b1[0], G))
    b_packed = b_packed.at[2, :ND].set(b2[0])
    b_packed = b_packed.at[3, :ACTION_DIM].set(b3[0])
    return w_packed, b_packed


# ---------------------------------------------------------------------------
# Kernel: 4 lane-dense matmuls + ReLU/tanh, everything stays [block_b, 128]
# ---------------------------------------------------------------------------
def _actor_fused_kernel(x_ref, w_ref, b_ref, o_ref, *, compute_dtype):
    cd = compute_dtype
    x = x_ref[...].astype(cd)                                        # [bb, 32]

    # layer A: deepset layer-0 (grip/obj/goal fused via packed weights)
    h = jnp.dot(x, w_ref[0:K_PAD, :], preferred_element_type=jnp.float32)
    h = jnp.maximum(h + b_ref[0:1, :], 0.0)                          # [bb, 128]

    # layer B: deepset layer-1 (block-diagonal over the 4 goal blocks)
    h = jnp.dot(h.astype(cd), w_ref[K_PAD:K_PAD + WIDTH, :],
                preferred_element_type=jnp.float32)
    h = jnp.maximum(h + b_ref[1:2, :], 0.0)                          # [bb, 128]

    # layer C: mean-pool over goals fused with the post-pool hidden layer
    h = jnp.dot(h.astype(cd), w_ref[K_PAD + WIDTH:K_PAD + 2 * WIDTH, :],
                preferred_element_type=jnp.float32)
    h = jnp.maximum(h + b_ref[2:3, :], 0.0)                          # [bb, 128]

    # layer D: final linear (lane-padded) + tanh, lane-dense store
    a = jnp.dot(h.astype(cd), w_ref[K_PAD + 2 * WIDTH:K_PAD + 3 * WIDTH, :],
                preferred_element_type=jnp.float32)
    o_ref[...] = jnp.tanh(a + b_ref[3:4, :])                         # [bb, 128]


@functools.partial(jax.jit, static_argnames=("block_b",))
def actor_forward(state, w_packed, b_packed, *, block_b=8):
    """Actor.forward(state) for the 'deepset' net_type (forward only)."""
    B = state.shape[0]
    pad_b = pl.cdiv(B, block_b) * block_b
    # single pad op: batch -> multiple of block_b, lanes 30 -> 32
    x = jnp.pad(state.astype(jnp.float32),
                ((0, pad_b - B), (0, K_PAD - STATE_DIM)))

    kernel = functools.partial(_actor_fused_kernel,
                               compute_dtype=w_packed.dtype)
    out = pl.pallas_call(
        kernel,
        out_shape=jax.ShapeDtypeStruct((pad_b, WIDTH), jnp.float32),
        grid=(pad_b // block_b,),
        in_specs=[
            pl.BlockSpec((block_b, K_PAD), lambda i: (i, 0)),   # state rows
            pl.BlockSpec((W_ROWS, WIDTH), lambda i: (0, 0)),    # weights (1 DMA)
            pl.BlockSpec((B_ROWS, WIDTH), lambda i: (0, 0)),    # biases  (1 DMA)
        ],
        out_specs=pl.BlockSpec((block_b, WIDTH), lambda i: (i, 0)),
        compiler_params=pltpu.CompilerParams(
            dimension_semantics=("parallel",)),   # megacore split on v7x
    )(x, w_packed, b_packed)
    return out[:B, :ACTION_DIM]


# ---------------------------------------------------------------------------
# Deterministic init (PyTorch nn.Linear default U(-1/sqrt(fan_in), ...))
# and pure-JAX reference matching the PyTorch semantics.
# ---------------------------------------------------------------------------
def _linear_init(key, fan_in, fan_out):
    kw, kb = jax.random.split(key)
    bound = 1.0 / float(fan_in) ** 0.5
    w = jax.random.uniform(kw, (fan_in, fan_out), jnp.float32, -bound, bound)
    b = jax.random.uniform(kb, (1, fan_out), jnp.float32, -bound, bound)
    return w, b


def _reference_forward(state, params):
    (w0, b0), (w1, b1), (w2, b2), (w3, b3) = params
    B = state.shape[0]
    grip = state[:, :SHARED_DIM]
    obj = state[:, SHARED_DIM:SHARED_DIM + SEPERATE_DIM].reshape(
        B, NUM_GOALS, SINGLE_SEP_DIM)
    g = state[:, SHARED_DIM + SEPERATE_DIM:
              SHARED_DIM + SEPERATE_DIM + GOAL_DIM].reshape(
        B, NUM_GOALS, SINGLE_GOAL_DIM)
    grip_rep = jnp.broadcast_to(grip[:, None, :], (B, NUM_GOALS, SHARED_DIM))
    x = jnp.concatenate([grip_rep, obj, g], axis=-1)
    h = jax.nn.relu(x @ w0 + b0)
    h = jax.nn.relu(h @ w1 + b1)
    pooled = h.mean(axis=1)
    h2 = jax.nn.relu(pooled @ w2 + b2)
    return jnp.tanh(h2 @ w3 + b3)


if __name__ == "__main__":
    key = jax.random.PRNGKey(0)
    k_state, k_state2, k0, k1, k2, k3 = jax.random.split(key, 6)

    params = (
        _linear_init(k0, IN_DIM, NET_DIM),      # deepset layer 0
        _linear_init(k1, NET_DIM, NET_DIM),     # deepset layer 1
        _linear_init(k2, NET_DIM, NET_DIM),     # post-pool hidden
        _linear_init(k3, NET_DIM, ACTION_DIM),  # final
    )
    # TODO(synk): get_action / get_action_noise exploration-noise paths are not
    # implemented; only Actor.forward (the deterministic tanh policy) is.

    # ---- small batch (B=2), f32 weights ----
    state = jax.random.normal(k_state, (2, STATE_DIM), jnp.float32)
    ref = _reference_forward(state, params)

    w_f32, b_f32 = pack_params(params, jnp.float32)
    out_f32 = actor_forward(state, w_f32, b_f32, block_b=8)
    jax.block_until_ready(out_f32)
    assert out_f32.shape == (2, ACTION_DIM)
    assert jnp.allclose(out_f32, ref, rtol=2e-3, atol=2e-3), (out_f32, ref)

    # ---- same batch, bf16 MXU operands (v6e/v7x fast path), f32 accumulate ----
    w_bf16, b_bf16 = pack_params(params, jnp.bfloat16)
    out_bf16 = actor_forward(state, w_bf16, b_bf16, block_b=8)
    jax.block_until_ready(out_bf16)
    assert jnp.allclose(out_bf16, ref, rtol=0.0, atol=5e-2), (out_bf16, ref)

    # ---- larger batch exercising the row-block grid (parallel on v7x) ----
    state_big = jax.random.normal(k_state2, (64, STATE_DIM), jnp.float32)
    ref_big = _reference_forward(state_big, params)
    out_big = actor_forward(state_big, w_f32, b_f32, block_b=16)
    jax.block_until_ready(out_big)
    assert out_big.shape == (64, ACTION_DIM)
    assert jnp.allclose(out_big, ref_big, rtol=2e-3, atol=2e-3)

    print("KERNEL_OK")
</pallas_src>

<mosaic_0001>
module attributes {stable_mosaic.version = 11 : i64} {
  func.func @_actor_fused_kernel(%arg0: i32, %arg1: memref<8x32xf32, #tpu.memory_space<vmem>>, %arg2: memref<416x128xf32, #tpu.memory_space<vmem>>, %arg3: memref<8x128xf32, #tpu.memory_space<vmem>>, %arg4: memref<8x128xf32, #tpu.memory_space<vmem>>) attributes {dimension_semantics = [#tpu.dimension_semantics<parallel>], iteration_bounds = array<i64: 1>, scalar_prefetch = 0 : i64, scratch_operands = 0 : i64, tpu.core_type = #tpu.core_type<tc>, window_params = [{transform_indices = @transform_0, window_bounds = array<i64: 8, 32>}, {pipeline_mode = #tpu.pipeline_mode<synchronous>, transform_indices = @transform_1, window_bounds = array<i64: 416, 128>}, {pipeline_mode = #tpu.pipeline_mode<synchronous>, transform_indices = @transform_2, window_bounds = array<i64: 8, 128>}, {transform_indices = @transform_3, window_bounds = array<i64: 8, 128>}]} {
    %c0 = arith.constant 0 : index
    %c0_0 = arith.constant 0 : index
    %0 = vector.load %arg1[%c0, %c0_0] : memref<8x32xf32, #tpu.memory_space<vmem>>, vector<8x32xf32>
    %c0_1 = arith.constant 0 : index
    %c0_2 = arith.constant 0 : index
    %1 = vector.load %arg2[%c0_1, %c0_2] : memref<416x128xf32, #tpu.memory_space<vmem>>, vector<32x128xf32>
    %cst = arith.constant dense<0.000000e+00> : vector<8x128xf32>
    %2 = tpu.matmul %0, %1, %cst {dimension_numbers = #tpu.dot_dimension_numbers<[1], [0], [0], [1], [0, 0, 1, 1], [], []>} : vector<8x32xf32>, vector<32x128xf32>, vector<8x128xf32> -> vector<8x128xf32>
    %c0_3 = arith.constant 0 : index
    %c0_4 = arith.constant 0 : index
    %3 = vector.load %arg3[%c0_3, %c0_4] : memref<8x128xf32, #tpu.memory_space<vmem>>, vector<1x128xf32>
    %4 = vector.broadcast %3 : vector<1x128xf32> to vector<8x128xf32>
    %5 = arith.addf %2, %4 : vector<8x128xf32>
    %cst_5 = arith.constant 0.000000e+00 : f32
    %6 = vector.broadcast %cst_5 : f32 to vector<8x128xf32>
    %7 = arith.maximumf %5, %6 : vector<8x128xf32>
    %c32 = arith.constant 32 : index
    %c0_6 = arith.constant 0 : index
    %8 = vector.load %arg2[%c32, %c0_6] : memref<416x128xf32, #tpu.memory_space<vmem>>, vector<128x128xf32>
    %cst_7 = arith.constant dense<0.000000e+00> : vector<8x128xf32>
    %9 = tpu.matmul %7, %8, %cst_7 {dimension_numbers = #tpu.dot_dimension_numbers<[1], [0], [0], [1], [0, 0, 1, 1], [], []>} : vector<8x128xf32>, vector<128x128xf32>, vector<8x128xf32> -> vector<8x128xf32>
    %c1 = arith.constant 1 : index
    %c0_8 = arith.constant 0 : index
    %10 = vector.load %arg3[%c1, %c0_8] : memref<8x128xf32, #tpu.memory_space<vmem>>, vector<1x128xf32>
    %11 = vector.broadcast %10 : vector<1x128xf32> to vector<8x128xf32>
    %12 = arith.addf %9, %11 : vector<8x128xf32>
    %cst_9 = arith.constant 0.000000e+00 : f32
    %13 = vector.broadcast %cst_9 : f32 to vector<8x128xf32>
    %14 = arith.maximumf %12, %13 : vector<8x128xf32>
    %c160 = arith.constant 160 : index
    %c0_10 = arith.constant 0 : index
    %15 = vector.load %arg2[%c160, %c0_10] : memref<416x128xf32, #tpu.memory_space<vmem>>, vector<128x128xf32>
    %cst_11 = arith.constant dense<0.000000e+00> : vector<8x128xf32>
    %16 = tpu.matmul %14, %15, %cst_11 {dimension_numbers = #tpu.dot_dimension_numbers<[1], [0], [0], [1], [0, 0, 1, 1], [], []>} : vector<8x128xf32>, vector<128x128xf32>, vector<8x128xf32> -> vector<8x128xf32>
    %c2 = arith.constant 2 : index
    %c0_12 = arith.constant 0 : index
    %17 = vector.load %arg3[%c2, %c0_12] : memref<8x128xf32, #tpu.memory_space<vmem>>, vector<1x128xf32>
    %18 = vector.broadcast %17 : vector<1x128xf32> to vector<8x128xf32>
    %19 = arith.addf %16, %18 : vector<8x128xf32>
    %cst_13 = arith.constant 0.000000e+00 : f32
    %20 = vector.broadcast %cst_13 : f32 to vector<8x128xf32>
    %21 = arith.maximumf %19, %20 : vector<8x128xf32>
    %c288 = arith.constant 288 : index
    %c0_14 = arith.constant 0 : index
    %22 = vector.load %arg2[%c288, %c0_14] : memref<416x128xf32, #tpu.memory_space<vmem>>, vector<128x128xf32>
    %cst_15 = arith.constant dense<0.000000e+00> : vector<8x128xf32>
    %23 = tpu.matmul %21, %22, %cst_15 {dimension_numbers = #tpu.dot_dimension_numbers<[1], [0], [0], [1], [0, 0, 1, 1], [], []>} : vector<8x128xf32>, vector<128x128xf32>, vector<8x128xf32> -> vector<8x128xf32>
    %c3 = arith.constant 3 : index
    %c0_16 = arith.constant 0 : index
    %24 = vector.load %arg3[%c3, %c0_16] : memref<8x128xf32, #tpu.memory_space<vmem>>, vector<1x128xf32>
    %25 = vector.broadcast %24 : vector<1x128xf32> to vector<8x128xf32>
    %26 = arith.addf %23, %25 : vector<8x128xf32>
    %27 = math.tanh %26 : vector<8x128xf32>
    %c0_17 = arith.constant 0 : index
    %c0_18 = arith.constant 0 : index
    %28 = vector.load %arg4[%c0_17, %c0_18] : memref<8x128xf32, #tpu.memory_space<vmem>>, vector<8x128xf32>
    tpu.vector_store %arg4[%c0_17, %c0_18], %27 {strides = array<i32>} : memref<8x128xf32, #tpu.memory_space<vmem>>, vector<8x128xf32>,
    return
  }
  func.func @transform_0(%arg0: i32) -> (i32, i32) {
    %c0_i32 = arith.constant 0 : i32
    %c0_i32_0 = arith.constant 0 : i32
    return %arg0, %c0_i32 : i32, i32
  }
  func.func @transform_1(%arg0: i32) -> (i32, i32) {
    %c0_i32 = arith.constant 0 : i32
    %c0_i32_0 = arith.constant 0 : i32
    %c0_i32_1 = arith.constant 0 : i32
    return %c0_i32, %c0_i32_0 : i32, i32
  }
  func.func @transform_2(%arg0: i32) -> (i32, i32) {
    %c0_i32 = arith.constant 0 : i32
    %c0_i32_0 = arith.constant 0 : i32
    %c0_i32_1 = arith.constant 0 : i32
    return %c0_i32, %c0_i32_0 : i32, i32
  }
  func.func @transform_3(%arg0: i32) -> (i32, i32) {
    %c0_i32 = arith.constant 0 : i32
    %c0_i32_0 = arith.constant 0 : i32
    return %arg0, %c0_i32 : i32, i32
  }
}

</mosaic_0001>

<bundles_post_ra>
// kernel: actor_forward.1
= control target key start
LH: loop header
LB: loop body
LE: loop exit
PB: predicated region body
PF: predicated region fallthrough
CT: control target
= control target key end

     0   :  { %8 = vsyncpa [#allocation3], 0  ;;  %s682_s12 = smov [#allocation2]   ;;  %s772_s0 = inlined_call_operand.vmem [shape: f32[8,32], index: 0, kind: input, shape index: {}]   ;;  %s773_s1 = inlined_call_operand.hbm [shape: f32[416,128], index: 1, kind: input, shape index: {}]   ;;  %s774_s2 = inlined_call_operand.vmem [shape: f32[8,128], index: 2, kind: input, shape index: {}]   ;;  %s775_s3 = inlined_call_operand.vmem [shape: f32[8,128], index: 3, kind: output, shape index: {}]  }
   0x1   :  { %s16_s13 = sshll.u32 %s682_s12, 4  ;;  %s658_s16 = scalar_lea.hbm %s773_s1, 6656  ;;  %s17_s13 = int_to_ptr.vmem [resolvable:$true] %s16_s13 }
   0x2   :  { %p659_p0 = scmp.ne.s32.totalorder %s773_s1, %s658_s16  ;;  %p662_p1 = scmp.lt.u32.totalorder %s658_s16, %s773_s1 }
   0x4   :  { %p664_p2 = pnand %p662_p1, %p659_p0 }
   0x6   :  { %667 = shalt.err (!%p664_p2)
}
   0x7   :  { %s668_s21 = scalar_lea.vmem %s17_s13, 6656  ;;  %p673_p4 = scmp.lt.s32.totalorder %s17_s13, %s17_s13 }
   0x8   :  { %p669_p3 = scmp.ne.s32.totalorder %s17_s13, %s668_s21  ;;  %p674_p5 = scmp.lt.s32.totalorder %s668_s21, %s668_s21 }
   0xa   :  { %p675_p6 = por %p674_p5, %p673_p4 }
   0xc   :  { %p676_p7 = pnand %p675_p6, %p669_p3 }
   0xe   :  { %679 = shalt.err (!%p676_p7)
}
   0xf   :  { %s683_s22 = smov 128   ;;  %s684_s23 = smov 8  }
  0x10   :  { %22 = dma.hbm_to_vmem [thread:$0]  %s773_s1, 6656, %s17_s13, [#allocation3], %s683_s22, %s683_s22, %s684_s23  }
  0x11   :  { %680 = dma.done.wait [#allocation3], 6656  }
  0x12   :  { %681 = vsyncadd [#allocation3], 4294960640  ;;  %v685_v0 = vmov 0.0|0.0   ;;  %vm686_vm0 = vmmov 0   ;;  %v687_v1 = vmov 0.0   ;;  %v29_v2 = vld [vmem:[#allocation2] sm:$0xff] }
  0x13   :  { %572 = vmatprep.subr.bf16.mxu0 %v685_v0  ;;  %464 = vmatprep.mubr.msk.f32.mxu0 %vm686_vm0, %v687_v1  ;;  %v30_v3 = vld [vmem:[#allocation2 + $0x8] sm:$0xff]  ;;  %v31_v4 = vld [vmem:[#allocation2 + $0x10] sm:$0xff]  ;;  %v32_v6 = vld [vmem:[#allocation2 + $0x18] sm:$0xff]  ;;  %vm38_vm1 = vcmask 261120  }
  0x14   :  { %578 = vmatprep.subr.bf16.mxu1 %v685_v0  ;;  %499 = vmatprep.mubr.msk.f32.mxu1 %vm686_vm0, %v687_v1  ;;  %v573_v5 = vpack.c.bf16 %v30_v3, %v29_v2  ;;  %v113_v7 = vld [vmem:[#allocation2 + $0x20] sm:$0xff]  ;;  %v114_v8 = vld [vmem:[#allocation2 + $0x28] sm:$0xff]  ;;  %v115_v9 = vld [vmem:[#allocation2 + $0x30] sm:$0xff]  ;;  %v576_v11 = vpack.c.bf16 %v32_v6, %v31_v4 }
  0x15   :  { %v116_v10 = vld [vmem:[#allocation2 + $0x38] sm:$0xff]  ;;  %v579_v12 = vpack.c.bf16 %v114_v8, %v113_v7  ;;  %v117_v14 = vld [vmem:[#allocation2 + $0x40] sm:$0xff]  ;;  %v118_v15 = vld [vmem:[#allocation2 + $0x48] sm:$0xff] }
  0x16   :  { %574 = vmatpush3.bf16.msra.mxu0 %v573_v5  ;;  %v582_v13 = vpack.c.bf16 %v116_v10, %v115_v9  ;;  %v28_v16 = vld [vmem:[%s772_s0] sm:$0xff]  ;;  %v585_v17 = vpack.c.bf16 %v118_v15, %v117_v14  ;;  %v119_v18 = vld [vmem:[#allocation2 + $0x50] sm:$0xff]  ;;  %v121_v21 = vld [vmem:[#allocation2 + $0x60] sm:$0xff] }
  0x17   :  { %575 = vmatprep.subr.bf16.mxu0 %v685_v0  ;;  %580 = vmatpush3.bf16.msra.mxu1 %v579_v12  ;;  %v120_v19 = vld [vmem:[#allocation2 + $0x58] sm:$0xff]  ;;  %v122_v22 = vld [vmem:[#allocation2 + $0x68] sm:$0xff]  ;;  %v123_v24 = vld [vmem:[#allocation2 + $0x70] sm:$0xff] }
  0x18   :  { %581 = vmatprep.subr.bf16.mxu1 %v685_v0  ;;  %v588_v20 = vpack.c.bf16 %v120_v19, %v119_v18  ;;  %v591_v23 = vpack.c.bf16 %v122_v22, %v121_v21  ;;  %v124_v25 = vld [vmem:[#allocation2 + $0x78] sm:$0xff]  ;;  %v125_v27 = vld [vmem:[#allocation2 + $0x80] sm:$0xff]  ;;  %v126_v28 = vld [vmem:[#allocation2 + $0x88] sm:$0xff] }
  0x19   :  { %v594_v26 = vpack.c.bf16 %v124_v25, %v123_v24  ;;  %v597_v29 = vpack.c.bf16 %v126_v28, %v125_v27  ;;  %v127_v30 = vld [vmem:[#allocation2 + $0x90] sm:$0xff]  ;;  %v128_v31 = vld [vmem:[#allocation2 + $0x98] sm:$0xff]  ;;  %v205_v33 = vld [vmem:[#allocation2 + $0xa0] sm:$0xff] }
  0x1a   :  { %577 = vmatpush3.bf16.msra.mxu0 %v576_v11  ;;  %v600_v32 = vpack.c.bf16 %v128_v31, %v127_v30  ;;  %v206_v34 = vld [vmem:[#allocation2 + $0xa8] sm:$0xff]  ;;  %v207_v35 = vld [vmem:[#allocation2 + $0xb0] sm:$0xff]  ;;  %v208_v37 = vld [vmem:[#allocation2 + $0xb8] sm:$0xff] }
  0x1b   :  { %602 = vmatprep.subr.bf16.mxu0 %v685_v0  ;;  %583 = vmatpush3.bf16.msra.mxu1 %v582_v13  ;;  %v603_v36 = vpack.c.bf16 %v206_v34, %v205_v33  ;;  %v606_v38 = vpack.c.bf16 %v208_v37, %v207_v35  ;;  %v209_v39 = vld [vmem:[#allocation2 + $0xc0] sm:$0xff]  ;;  %v210_v40 = vld [vmem:[#allocation2 + $0xc8] sm:$0xff]  ;;  %v211_v42 = vld [vmem:[#allocation2 + $0xd0] sm:$0xff] }
  0x1c   :  { %584 = vmatprep.subr.bf16.mxu1 %v685_v0  ;;  %v609_v41 = vpack.c.bf16 %v210_v40, %v209_v39  ;;  %v212_v43 = vld [vmem:[#allocation2 + $0xd8] sm:$0xff]  ;;  %v213_v45 = vld [vmem:[#allocation2 + $0xe0] sm:$0xff]  ;;  %v214_v46 = vld [vmem:[#allocation2 + $0xe8] sm:$0xff] }
  0x1d   :  { %465 = vmatmul.mubr.msk.f32.vlgmr.msra.gmra.mrb[0].mxu0 %vm38_vm1, %v28_v16  ;;  %v612_v44 = vpack.c.bf16 %v212_v43, %v211_v42  ;;  %v615_v47 = vpack.c.bf16 %v214_v46, %v213_v45  ;;  %v215_v48 = vld [vmem:[#allocation2 + $0xf0] sm:$0xff]  ;;  %v216_v49 = vld [vmem:[#allocation2 + $0xf8] sm:$0xff]  ;;  %v217_v51 = vld [vmem:[#allocation2 + $0x100] sm:$0xff] }
  0x1e   :  { %534 = vmatprep.mubr.msk.f32.mxu0 %vm686_vm0, %v687_v1  ;;  %604 = vmatpush3.bf16.msra.mxu0 %v603_v36  ;;  %v618_v50 = vpack.c.bf16 %v216_v49, %v215_v48  ;;  %v218_v52 = vld [vmem:[#allocation2 + $0x108] sm:$0xff]  ;;  %v395_v54 = vld [vmem:[%s774_s2] ss:$0 sm:$0xff]  ;;  %v219_v59 = vld [vmem:[#allocation2 + $0x110] sm:$0xff] }
  0x1f   :  { %586 = vmatpush3.bf16.msra.mxu1 %v585_v17  ;;  %605 = vmatprep.subr.bf16.mxu0 %v685_v0  ;;  %v621_v53 = vpack.c.bf16 %v218_v52, %v217_v51  ;;  %v220_v60 = vld [vmem:[#allocation2 + $0x118] sm:$0xff]  ;;  %v297_v62 = vld [vmem:[#allocation2 + $0x120] sm:$0xff]  ;;  %v298_v63 = vld [vmem:[#allocation2 + $0x128] sm:$0xff] }
  0x20   :  { %587 = vmatprep.subr.bf16.mxu1 %v685_v0  ;;  %v624_v61 = vpack.c.bf16 %v220_v60, %v219_v59  ;;  %v299_v2 = vld [vmem:[#allocation2 + $0x130] sm:$0xff]  ;;  %v627_v3 = vpack.c.bf16 %v298_v63, %v297_v62  ;;  %v300_v4 = vld [vmem:[#allocation2 + $0x138] sm:$0xff]  ;;  %v301_v6 = vld [vmem:[#allocation2 + $0x140] sm:$0xff] }
  0x21   :  { %v630_v5 = vpack.c.bf16 %v300_v4, %v299_v2  ;;  %v302_v7 = vld [vmem:[#allocation2 + $0x148] sm:$0xff]  ;;  %v304_v9 = vld [vmem:[#allocation2 + $0x158] sm:$0xff]  ;;  %v305_v11 = vld [vmem:[#allocation2 + $0x160] sm:$0xff] }
  0x22   :  { %607 = vmatpush3.bf16.msra.mxu0 %v606_v38  ;;  %v633_v8 = vpack.c.bf16 %v302_v7, %v301_v6  ;;  %v306_v12 = vld [vmem:[#allocation2 + $0x168] sm:$0xff]  ;;  %v307_v14 = vld [vmem:[#allocation2 + $0x170] sm:$0xff]  ;;  %v308_v15 = vld [vmem:[#allocation2 + $0x178] sm:$0xff] }
  0x23   :  { %589 = vmatpush3.bf16.msra.mxu1 %v588_v20  ;;  %608 = vmatprep.subr.bf16.mxu0 %v685_v0  ;;  %v639_v13 = vpack.c.bf16 %v306_v12, %v305_v11  ;;  %v642_v16 = vpack.c.bf16 %v308_v15, %v307_v14  ;;  %v309_v17 = vld [vmem:[#allocation2 + $0x180] sm:$0xff]  ;;  %v310_v18 = vld [vmem:[#allocation2 + $0x188] sm:$0xff]  ;;  %v397_v20 = vld [vmem:[%s774_s2 + $0x1] ss:$0 sm:$0xff] }
  0x24   :  { %590 = vmatprep.subr.bf16.mxu1 %v685_v0  ;;  %v645_v19 = vpack.c.bf16 %v310_v18, %v309_v17  ;;  %v311_v25 = vld [vmem:[#allocation2 + $0x190] sm:$0xff]  ;;  %v398_v28 = vld [vmem:[%s774_s2 + $0x2] ss:$0 sm:$0xff] }
  0x26   :  { %610 = vmatpush3.bf16.msra.mxu0 %v609_v41 }
  0x27   :  { %592 = vmatpush3.bf16.msra.mxu1 %v591_v23  ;;  %611 = vmatprep.subr.bf16.mxu0 %v685_v0 }
  0x28   :  { %593 = vmatprep.subr.bf16.mxu1 %v685_v0 }
  0x2a   :  { %613 = vmatpush3.bf16.msra.mxu0 %v612_v44 }
  0x2b   :  { %595 = vmatpush3.bf16.msra.mxu1 %v594_v26  ;;  %614 = vmatprep.subr.bf16.mxu0 %v685_v0  ;;  %v312_v26 = vld [vmem:[#allocation2 + $0x198] sm:$0xff] }
  0x2c   :  { %596 = vmatprep.subr.bf16.mxu1 %v685_v0  ;;  %v648_v27 = vpack.c.bf16 %v312_v26, %v311_v25 }
  0x2e   :  { %616 = vmatpush3.bf16.msra.mxu0 %v615_v47 }
  0x2f   :  { %598 = vmatpush3.bf16.msra.mxu1 %v597_v29  ;;  %617 = vmatprep.subr.bf16.mxu0 %v685_v0 }
  0x30   :  { %599 = vmatprep.subr.bf16.mxu1 %v685_v0 }
  0x32   :  { %619 = vmatpush3.bf16.msra.mxu0 %v618_v50 }
  0x33   :  { %601 = vmatpush3.bf16.msra.mxu1 %v600_v32  ;;  %620 = vmatprep.subr.bf16.mxu0 %v685_v0  ;;  %v399_v32 = vld [vmem:[%s774_s2 + $0x3] ss:$0 sm:$0xff] }
  0x34   :  { %626 = vmatprep.subr.bf16.mxu1 %v685_v0 }
  0x36   :  { %622 = vmatpush3.bf16.msra.mxu0 %v621_v53 }
  0x37   :  { %623 = vmatprep.subr.bf16.mxu0 %v685_v0 }
  0x3a   :  { %625 = vmatpush3.bf16.msra.mxu0 %v624_v61 }
  0xf0   :  { %v108_v55 = vpop.f32.mrb[0].mxu0 }
  0xf1   :  { %v109_v56 = vadd.f32 %v395_v54, %v108_v55  ;;  %v466_v57 = vpop.f32.mrb[1].mxu0 }
  0xf3   :  { %v112_v58 = vmax.f32 %v109_v56, 0.0 }
  0xf5   :  { %500 = vmatmul.mubr.f32.vlgmr.msra.gmra.mrb[0].mxu1 %v112_v58 }
  0xf6   :  { %569 = vmatprep.mubr.msk.f32.mxu1 %vm686_vm0, %v687_v1  ;;  %628 = vmatpush3.bf16.msra.mxu1 %v627_v3  ;;  %v303_v1 = vld [vmem:[#allocation2 + $0x150] sm:$0xff] }
  0xf7   :  { %629 = vmatprep.subr.bf16.mxu1 %v685_v0  ;;  %v636_v10 = vpack.c.bf16 %v304_v9, %v303_v1 }
  0xfa   :  { %631 = vmatpush3.bf16.msra.mxu1 %v630_v5 }
  0xfb   :  { %632 = vmatprep.subr.bf16.mxu1 %v685_v0 }
  0xfe   :  { %634 = vmatpush3.bf16.msra.mxu1 %v633_v8 }
  0xff   :  { %635 = vmatprep.subr.bf16.mxu1 %v685_v0 }
 0x102   :  { %637 = vmatpush3.bf16.msra.mxu1 %v636_v10 }
 0x103   :  { %638 = vmatprep.subr.bf16.mxu1 %v685_v0 }
 0x106   :  { %640 = vmatpush3.bf16.msra.mxu1 %v639_v13 }
 0x107   :  { %641 = vmatprep.subr.bf16.mxu1 %v685_v0 }
 0x10a   :  { %643 = vmatpush3.bf16.msra.mxu1 %v642_v16 }
 0x10b   :  { %644 = vmatprep.subr.bf16.mxu1 %v685_v0 }
 0x10e   :  { %646 = vmatpush3.bf16.msra.mxu1 %v645_v19 }
 0x10f   :  { %647 = vmatprep.subr.bf16.mxu1 %v685_v0 }
 0x112   :  { %649 = vmatpush3.bf16.msra.mxu1 %v648_v27 }
 0x1c8   :  { %v200_v21 = vpop.f32.mrb[0].mxu1 }
 0x1c9   :  { %v201_v22 = vadd.f32 %v397_v20, %v200_v21  ;;  %v501_v23 = vpop.f32.mrb[1].mxu1 }
 0x1cb   :  { %v204_v24 = vmax.f32 %v201_v22, 0.0 }
 0x1cd   :  { %535 = vmatmul.mubr.f32.vlgmr.msra.gmra.mrb[2].mxu0 %v204_v24 }
 0x2a0   :  { %v292_v29 = vpop.f32.mrb[2].mxu0 }
 0x2a1   :  { %v293_v30 = vadd.f32 %v398_v28, %v292_v29  ;;  %v536_v0 = vpop.f32.mrb[3].mxu0 }
 0x2a3   :  { %v296_v31 = vmax.f32 %v293_v30, 0.0 }
 0x2a5   :  { %570 = vmatmul.mubr.f32.vlgmr.msra.gmra.mrb[2].mxu1 %v296_v31 }
 0x378   :  { %v384_v33 = vpop.f32.mrb[2].mxu1 }
 0x379   :  { %v385_v34 = vadd.f32 %v399_v32, %v384_v33  ;;  %v571_v35 = vpop.f32.mrb[3].mxu1 }
 0x37b   :  { %656 = vtanh.f32 %v385_v34 }
 0x385   :  { %v657_v36 = vpop.eup %656 }
 0x386   :  { %389 = vst [vmem:[%s775_s3] sm:$0xff] %v657_v36 }
 0x387   :  { %394 = vsyncpa [#allocation3], 1 }

</bundles_post_ra>
